<compile_context>
chip_gen: v6e
topology: v6e:2x2x1
jax: 0.10.0
libtpu: 0.0.40
codegen_flags: <defaults>
</compile_context>

<pallas_src>
import numpy as np
import jax
import jax.numpy as jnp
from jax.experimental import pallas as pl
from jax.experimental.pallas import tpu as pltpu


def _make_concat_dma_kernel(channel_sizes):
    """Kernel that concatenates len(channel_sizes) NCHW tensors on axis 1 via DMA."""
    offsets = np.cumsum([0] + list(channel_sizes)).tolist()
    n = len(channel_sizes)

    def kernel(*refs):
        # refs = (*in_hbm_refs, out_hbm_ref, dma_sems)
        in_refs = refs[:n]
        out_ref = refs[n]
        sem = refs[n + 1]

        copies = []
        for i, c in enumerate(channel_sizes):
            lo = offsets[i]
            cp = pltpu.make_async_copy(
                in_refs[i],                       # full input, HBM
                out_ref.at[:, lo:lo + c, :, :],   # static channel slice, HBM
                sem.at[i],
            )
            cp.start()
            copies.append(cp)
        # All DMAs in flight; now block until every one has landed.
        for cp in copies:
            cp.wait()

    return kernel


def concat1(xs, dimension=1):
    """Pallas equivalent of Concat1.forward(x): torch.cat(x, dim=1) for NCHW inputs."""
    assert dimension == 1, "Concat1 in this model concatenates on the channel axis."
    assert len(xs) >= 1
    b, _, h, w = xs[0].shape
    dtype = xs[0].dtype
    for x in xs:
        assert x.shape[0] == b and x.shape[2] == h and x.shape[3] == w
        assert x.dtype == dtype

    channel_sizes = [int(x.shape[1]) for x in xs]
    c_total = sum(channel_sizes)
    out_shape = jax.ShapeDtypeStruct((b, c_total, h, w), dtype)

    kernel = _make_concat_dma_kernel(channel_sizes)

    # Pure HBM->HBM DMA kernel: no grid, no VMEM blocks, one DMA per input.
    return pl.pallas_call(
        kernel,
        out_shape=out_shape,
        in_specs=[pl.BlockSpec(memory_space=pl.ANY) for _ in xs],
        out_specs=pl.BlockSpec(memory_space=pl.ANY),
        scratch_shapes=[pltpu.SemaphoreType.DMA((len(xs),))],
    )(*xs)


if __name__ == "__main__":
    key = jax.random.PRNGKey(0)
    k1, k2, k3 = jax.random.split(key, 3)

    # Typical Concat1 use: merging feature maps with different channel counts.
    x0 = jax.random.normal(k1, (2, 4, 16, 16), dtype=jnp.float32)
    x1 = jax.random.normal(k2, (2, 8, 16, 16), dtype=jnp.float32)
    x2 = jax.random.normal(k3, (2, 4, 16, 16), dtype=jnp.float32)

    out = concat1([x0, x1, x2], dimension=1)
    out = jax.block_until_ready(out)

    ref = jnp.concatenate([x0, x1, x2], axis=1)
    assert out.shape == (2, 16, 16, 16), out.shape
    np.testing.assert_allclose(np.asarray(out), np.asarray(ref), rtol=0, atol=0)

    print("KERNEL_OK")
</pallas_src>

<mosaic_0001>
module attributes {stable_mosaic.version = 11 : i64} {
  func.func @kernel(%arg0: memref<2x4x16x16xf32, #tpu.memory_space<any>>, %arg1: memref<2x8x16x16xf32, #tpu.memory_space<any>>, %arg2: memref<2x4x16x16xf32, #tpu.memory_space<any>>, %arg3: memref<2x16x16x16xf32, #tpu.memory_space<any>>, %arg4: memref<3x!tpu.dma_semaphore, #tpu.memory_space<semaphore_mem>>) attributes {dimension_semantics = [], scalar_prefetch = 0 : i64, scratch_operands = 1 : i64, tpu.core_type = #tpu.core_type<tc>} {
    %c0_i32 = arith.constant 0 : i32
    %c0_i32_0 = arith.constant 0 : i32
    %c0_i32_1 = arith.constant 0 : i32
    %c0_i32_2 = arith.constant 0 : i32
    %c0_i32_3 = arith.constant 0 : i32
    %0 = tpu.memref_slice %arg3[%c0_i32_0, %c0_i32_1, %c0_i32_2, %c0_i32_3] : memref<2x16x16x16xf32, #tpu.memory_space<any>> -> memref<2x4x16x16xf32, #tpu.memory_space<any>>
    %1 = tpu.memref_slice %arg4[%c0_i32] : memref<3x!tpu.dma_semaphore, #tpu.memory_space<semaphore_mem>> -> memref<1x!tpu.dma_semaphore, #tpu.memory_space<semaphore_mem>>
    %2 = tpu.memref_squeeze %1 : memref<1x!tpu.dma_semaphore, #tpu.memory_space<semaphore_mem>> -> memref<!tpu.dma_semaphore, #tpu.memory_space<semaphore_mem>>
    tpu.enqueue_dma source(%arg0 : memref<2x4x16x16xf32, #tpu.memory_space<any>>) target(%0 : memref<2x4x16x16xf32, #tpu.memory_space<any>>) target_semaphore(%2 : memref<!tpu.dma_semaphore, #tpu.memory_space<semaphore_mem>>)
    %c1_i32 = arith.constant 1 : i32
    %c0_i32_4 = arith.constant 0 : i32
    %c4_i32 = arith.constant 4 : i32
    %c0_i32_5 = arith.constant 0 : i32
    %c0_i32_6 = arith.constant 0 : i32
    %3 = tpu.memref_slice %arg3[%c0_i32_4, %c4_i32, %c0_i32_5, %c0_i32_6] : memref<2x16x16x16xf32, #tpu.memory_space<any>> -> memref<2x8x16x16xf32, #tpu.memory_space<any>>
    %4 = tpu.memref_slice %arg4[%c1_i32] : memref<3x!tpu.dma_semaphore, #tpu.memory_space<semaphore_mem>> -> memref<1x!tpu.dma_semaphore, #tpu.memory_space<semaphore_mem>>
    %5 = tpu.memref_squeeze %4 : memref<1x!tpu.dma_semaphore, #tpu.memory_space<semaphore_mem>> -> memref<!tpu.dma_semaphore, #tpu.memory_space<semaphore_mem>>
    tpu.enqueue_dma source(%arg1 : memref<2x8x16x16xf32, #tpu.memory_space<any>>) target(%3 : memref<2x8x16x16xf32, #tpu.memory_space<any>>) target_semaphore(%5 : memref<!tpu.dma_semaphore, #tpu.memory_space<semaphore_mem>>)
    %c2_i32 = arith.constant 2 : i32
    %c0_i32_7 = arith.constant 0 : i32
    %c12_i32 = arith.constant 12 : i32
    %c0_i32_8 = arith.constant 0 : i32
    %c0_i32_9 = arith.constant 0 : i32
    %6 = tpu.memref_slice %arg3[%c0_i32_7, %c12_i32, %c0_i32_8, %c0_i32_9] : memref<2x16x16x16xf32, #tpu.memory_space<any>> -> memref<2x4x16x16xf32, #tpu.memory_space<any>>
    %7 = tpu.memref_slice %arg4[%c2_i32] : memref<3x!tpu.dma_semaphore, #tpu.memory_space<semaphore_mem>> -> memref<1x!tpu.dma_semaphore, #tpu.memory_space<semaphore_mem>>
    %8 = tpu.memref_squeeze %7 : memref<1x!tpu.dma_semaphore, #tpu.memory_space<semaphore_mem>> -> memref<!tpu.dma_semaphore, #tpu.memory_space<semaphore_mem>>
    tpu.enqueue_dma source(%arg2 : memref<2x4x16x16xf32, #tpu.memory_space<any>>) target(%6 : memref<2x4x16x16xf32, #tpu.memory_space<any>>) target_semaphore(%8 : memref<!tpu.dma_semaphore, #tpu.memory_space<semaphore_mem>>)
    %c0_i32_10 = arith.constant 0 : i32
    %c0_i32_11 = arith.constant 0 : i32
    %c0_i32_12 = arith.constant 0 : i32
    %c0_i32_13 = arith.constant 0 : i32
    %c0_i32_14 = arith.constant 0 : i32
    %9 = tpu.memref_slice %arg3[%c0_i32_11, %c0_i32_12, %c0_i32_13, %c0_i32_14] : memref<2x16x16x16xf32, #tpu.memory_space<any>> -> memref<2x4x16x16xf32, #tpu.memory_space<any>>
    %10 = tpu.memref_slice %arg4[%c0_i32_10] : memref<3x!tpu.dma_semaphore, #tpu.memory_space<semaphore_mem>> -> memref<1x!tpu.dma_semaphore, #tpu.memory_space<semaphore_mem>>
    %11 = tpu.memref_squeeze %10 : memref<1x!tpu.dma_semaphore, #tpu.memory_space<semaphore_mem>> -> memref<!tpu.dma_semaphore, #tpu.memory_space<semaphore_mem>>
    tpu.wait_dma2 semaphore(%11 : memref<!tpu.dma_semaphore, #tpu.memory_space<semaphore_mem>>) src(%arg0 : memref<2x4x16x16xf32, #tpu.memory_space<any>>) dst(%9 : memref<2x4x16x16xf32, #tpu.memory_space<any>>)
    %c1_i32_15 = arith.constant 1 : i32
    %c0_i32_16 = arith.constant 0 : i32
    %c4_i32_17 = arith.constant 4 : i32
    %c0_i32_18 = arith.constant 0 : i32
    %c0_i32_19 = arith.constant 0 : i32
    %12 = tpu.memref_slice %arg3[%c0_i32_16, %c4_i32_17, %c0_i32_18, %c0_i32_19] : memref<2x16x16x16xf32, #tpu.memory_space<any>> -> memref<2x8x16x16xf32, #tpu.memory_space<any>>
    %13 = tpu.memref_slice %arg4[%c1_i32_15] : memref<3x!tpu.dma_semaphore, #tpu.memory_space<semaphore_mem>> -> memref<1x!tpu.dma_semaphore, #tpu.memory_space<semaphore_mem>>
    %14 = tpu.memref_squeeze %13 : memref<1x!tpu.dma_semaphore, #tpu.memory_space<semaphore_mem>> -> memref<!tpu.dma_semaphore, #tpu.memory_space<semaphore_mem>>
    tpu.wait_dma2 semaphore(%14 : memref<!tpu.dma_semaphore, #tpu.memory_space<semaphore_mem>>) src(%arg1 : memref<2x8x16x16xf32, #tpu.memory_space<any>>) dst(%12 : memref<2x8x16x16xf32, #tpu.memory_space<any>>)
    %c2_i32_20 = arith.constant 2 : i32
    %c0_i32_21 = arith.constant 0 : i32
    %c12_i32_22 = arith.constant 12 : i32
    %c0_i32_23 = arith.constant 0 : i32
    %c0_i32_24 = arith.constant 0 : i32
    %15 = tpu.memref_slice %arg3[%c0_i32_21, %c12_i32_22, %c0_i32_23, %c0_i32_24] : memref<2x16x16x16xf32, #tpu.memory_space<any>> -> memref<2x4x16x16xf32, #tpu.memory_space<any>>
    %16 = tpu.memref_slice %arg4[%c2_i32_20] : memref<3x!tpu.dma_semaphore, #tpu.memory_space<semaphore_mem>> -> memref<1x!tpu.dma_semaphore, #tpu.memory_space<semaphore_mem>>
    %17 = tpu.memref_squeeze %16 : memref<1x!tpu.dma_semaphore, #tpu.memory_space<semaphore_mem>> -> memref<!tpu.dma_semaphore, #tpu.memory_space<semaphore_mem>>
    tpu.wait_dma2 semaphore(%17 : memref<!tpu.dma_semaphore, #tpu.memory_space<semaphore_mem>>) src(%arg2 : memref<2x4x16x16xf32, #tpu.memory_space<any>>) dst(%15 : memref<2x4x16x16xf32, #tpu.memory_space<any>>)
    return
  }
}

</mosaic_0001>

<bundles_post_ra>
// kernel: tpu_custom_call.1
= control target key start
LH: loop header
LB: loop body
LE: loop exit
PB: predicated region body
PF: predicated region fallthrough
CT: control target
= control target key end

     0   :  { %s102_s12 = smov 1024   ;;  %s103_s13 = smov 4096   ;;  %s150_s0 = inlined_call_operand.hbm [shape: f32[2,4,16,16], index: 0, kind: input, shape index: {}]   ;;  %s151_s1 = inlined_call_operand.hbm [shape: f32[2,8,16,16], index: 1, kind: input, shape index: {}]   ;;  %s152_s2 = inlined_call_operand.hbm [shape: f32[2,4,16,16], index: 2, kind: input, shape index: {}]   ;;  %s153_s3 = inlined_call_operand.hbm [shape: f32[2,16,16,16], index: 3, kind: output, shape index: {}]  }
   0x1   :  { %14 = sst [smem:[#allocation4]] %s102_s12  ;;  %s104_s14 = smov 64  }
   0x2   :  { %16 = sst [smem:[#allocation4 + $0x1]] %s103_s13  ;;  %s105_s15 = smov [#allocation2]  }
   0x3   :  { %18 = sst [smem:[#allocation4 + $0x2]] %s104_s14  ;;  %s106_s16 = smov 131072  }
   0x4   :  { %s107_s17 = smov 0   ;;  %s108_s22 = smov 2048  }
   0x5   :  { %20 = dma.general %s150_s0, 2048, %s153_s3, %s105_s15, %s106_s16, [#allocation4], %s107_s17, 0  }
   0x6   :  { %29 = sst [smem:[#allocation6]] %s108_s22  ;;  %s21_s25 = scalar_lea.hbm %s153_s3, 1024 }
   0x7   :  { %31 = sst [smem:[#allocation6 + $0x1]] %s103_s13  ;;  %s109_s26 = smov 128  }
   0x8   :  { %33 = sst [smem:[#allocation6 + $0x2]] %s109_s26  ;;  %s110_s27 = smov [#allocation2 + $0x1]  }
   0x9   :  { %35 = dma.general %s151_s1, 4096, %s21_s25, %s110_s27, %s106_s16, [#allocation6], %s107_s17, 0  }
   0xa   :  { %44 = sst [smem:[#allocation8]] %s102_s12  ;;  %s36_s5 = scalar_lea.hbm %s153_s3, 3072 }
   0xb   :  { %46 = sst [smem:[#allocation8 + $0x1]] %s103_s13  ;;  %s111_s0 = smov [#allocation2 + $0x2]  }
   0xc   :  { %48 = sst [smem:[#allocation8 + $0x2]] %s104_s14 }
   0xd   :  { %50 = dma.general %s152_s2, 2048, %s36_s5, %s111_s0, %s106_s16, [#allocation8], %s107_s17, 0  }
   0xe   :  { %96 = dma.done.wait [#allocation2], 2048 }
   0xf   :  { %97 = vsyncadd [#allocation2], 4294965248 }
  0x10   :  { %98 = dma.done.wait [#allocation2 + $0x1], 4096 }
  0x11   :  { %99 = vsyncadd [#allocation2 + $0x1], 4294963200 }
  0x12   :  { %100 = dma.done.wait [#allocation2 + $0x2], 2048 }
  0x13   :  { %101 = vsyncadd [#allocation2 + $0x2], 4294965248 }
  0x14   :  { %63 = vsyncmov [#allocation2] }
  0x17   :  { %s64_s1 = vpop.sfrf %63 }
  0x18   :  { %p83_p0 = scmp.ne.s32.totalorder %s64_s1, 0 }
  0x1a   :  { %68 = shalt.err (%p83_p0)  }
  0x1b   :  { %70 = vsyncmov [#allocation2 + $0x1] }
  0x1e   :  { %s71_s8 = vpop.sfrf %70 }
  0x1f   :  { %p84_p1 = scmp.ne.s32.totalorder %s71_s8, 0 }
  0x21   :  { %75 = shalt.err (%p84_p1)  }
  0x22   :  { %77 = vsyncmov [#allocation2 + $0x2] }
  0x25   :  { %s78_s3 = vpop.sfrf %77 }
  0x26   :  { %p85_p2 = scmp.ne.s32.totalorder %s78_s3, 0 }
  0x28   :  { %82 = shalt.err (%p85_p2)  }

</bundles_post_ra>
